<compile_context>
chip_gen: v6e
topology: v6e:2x2x1
jax: 0.10.0
libtpu: 0.0.40
codegen_flags: <defaults>
</compile_context>

<pallas_src>
import jax
import jax.numpy as jnp
from jax.experimental import pallas as pl
from jax.experimental.pallas import tpu as pltpu


def fcn_kernel(x_ref, w1_ref, b1_ref, w2_ref, b2_ref, o_ref):
    # x_ref:  (TB, IN_DIM)      f32   (cast to bf16 in-kernel for the MXU)
    # w1_ref: (IN_DIM, H_PAD)   bf16  (resident across grid steps)
    # b1_ref: (1, H_PAD)        f32   (resident)
    # w2_ref: (H_PAD, C_PAD)    bf16  (resident)
    # b2_ref: (1, C_PAD)        f32   (resident)
    # o_ref:  (TB, C_PAD)       bf16
    x = x_ref[...].astype(jnp.bfloat16)
    # MXU: bf16 x bf16 -> f32 accumulate.
    h = jnp.dot(x, w1_ref[...], preferred_element_type=jnp.float32) + b1_ref[...]
    h = jnp.maximum(h, 0.0)                                    # ReLU in f32
    z = jnp.dot(h.astype(jnp.bfloat16), w2_ref[...],
                preferred_element_type=jnp.float32) + b2_ref[...]
    o_ref[...] = jax.nn.sigmoid(z).astype(o_ref.dtype)         # sigmoid in f32, store bf16


def _round_up(x, m):
    return ((x + m - 1) // m) * m


def prepare_fcn_params(w1, b1, w2, b2):
    """One-time: zero-pad + cast params to the kernel's lane-dense layout.

    w1: [IN_DIM, H]; b1: [H]; w2: [H, C]; b2: [C].
    Padded w1 cols / b1 entries are zero -> padded hidden units are relu(0)=0, and
    their (zero) w2 rows contribute nothing. Padded class cols are sliced off later.
    """
    in_dim, hidden = w1.shape
    num_classes = w2.shape[1]
    H_PAD = _round_up(hidden, 128)        # 300 -> 384
    C_PAD = _round_up(num_classes, 128)   # 10  -> 128

    w1_p = jnp.zeros((in_dim, H_PAD), jnp.bfloat16).at[:, :hidden].set(
        w1.astype(jnp.bfloat16))
    b1_p = jnp.zeros((1, H_PAD), jnp.float32).at[:, :hidden].set(
        b1.reshape(1, hidden).astype(jnp.float32))
    w2_p = jnp.zeros((H_PAD, C_PAD), jnp.bfloat16).at[:hidden, :num_classes].set(
        w2.astype(jnp.bfloat16))
    b2_p = jnp.zeros((1, C_PAD), jnp.float32).at[:, :num_classes].set(
        b2.reshape(1, num_classes).astype(jnp.float32))
    return (w1_p, b1_p, w2_p, b2_p), num_classes


def fcn_forward(x, prepared_params, num_classes, *, tile_b=1024):
    """x: [B, IN_DIM] f32; prepared_params from prepare_fcn_params()."""
    w1_p, b1_p, w2_p, b2_p = prepared_params
    B, in_dim = x.shape
    H_PAD = w1_p.shape[1]
    C_PAD = w2_p.shape[1]

    # Batch tile: big (mem-bound, ~0.35us per grid step), clamped for tiny B,
    # and capped near B/2 for large batches so v7x's 2 TensorCores both get work.
    TB = min(tile_b, _round_up(B, 8))
    if B >= 512:
        TB = min(TB, _round_up(pl.cdiv(B, 2), 8))

    grid = (pl.cdiv(B, TB),)
    out = pl.pallas_call(
        fcn_kernel,
        out_shape=jax.ShapeDtypeStruct((B, C_PAD), jnp.bfloat16),
        grid_spec=pl.GridSpec(
            grid=grid,
            in_specs=[
                # x: streamed per batch tile, straight from HBM in f32.
                pl.BlockSpec((TB, in_dim), lambda i: (i, 0)),
                # weights/biases: constant block index -> stay resident in VMEM.
                pl.BlockSpec((in_dim, H_PAD), lambda i: (0, 0)),
                pl.BlockSpec((1, H_PAD), lambda i: (0, 0)),
                pl.BlockSpec((H_PAD, C_PAD), lambda i: (0, 0)),
                pl.BlockSpec((1, C_PAD), lambda i: (0, 0)),
            ],
            out_specs=pl.BlockSpec((TB, C_PAD), lambda i: (i, 0)),
        ),
        compiler_params=pltpu.CompilerParams(
            dimension_semantics=("parallel",),   # shard batch tiles across TCs (v7x)
            vmem_limit_bytes=32 * 1024 * 1024,   # keep big tiles safe on v5e (16 MiB default)
        ),
    )(x, w1_p, b1_p, w2_p, b2_p)

    # Slice off padded class columns; return f32 like the PyTorch module.
    return out[:, :num_classes].astype(jnp.float32)


def init_params(key, in_dim, num_classes, hidden=300):
    # nn.Linear-style init: U(-1/sqrt(fan_in), +1/sqrt(fan_in)).
    k1, k2, k3, k4 = jax.random.split(key, 4)
    bound1 = 1.0 / jnp.sqrt(in_dim)
    bound2 = 1.0 / jnp.sqrt(hidden)
    w1 = jax.random.uniform(k1, (in_dim, hidden), jnp.float32, -bound1, bound1)
    b1 = jax.random.uniform(k2, (hidden,), jnp.float32, -bound1, bound1)
    w2 = jax.random.uniform(k3, (hidden, num_classes), jnp.float32, -bound2, bound2)
    b2 = jax.random.uniform(k4, (num_classes,), jnp.float32, -bound2, bound2)
    return w1, b1, w2, b2


if __name__ == "__main__":
    IN_DIM = 32
    NUM_CLASSES = 10
    BATCH = 8

    key = jax.random.PRNGKey(0)
    kx, kp = jax.random.split(key)
    x = jax.random.normal(kx, (BATCH, IN_DIM), jnp.float32)
    w1, b1, w2, b2 = init_params(kp, IN_DIM, NUM_CLASSES)

    # Pad/cast weights once, reuse across calls.
    prepared, num_classes = prepare_fcn_params(w1, b1, w2, b2)

    out = fcn_forward(x, prepared, num_classes)
    out = jax.block_until_ready(out)
    assert out.shape == (BATCH, NUM_CLASSES)

    # Reference in plain JAX with the same bf16 rounding on the matmul inputs
    # (matches the MXU bf16-in / f32-accumulate path). The kernel additionally
    # stores its output in bf16, so allow ~1 bf16 ulp of slack.
    xb = x.astype(jnp.bfloat16).astype(jnp.float32)
    w1b = w1.astype(jnp.bfloat16).astype(jnp.float32)
    w2b = w2.astype(jnp.bfloat16).astype(jnp.float32)
    h_ref = jnp.maximum(xb @ w1b + b1[None, :], 0.0)
    h_ref = h_ref.astype(jnp.bfloat16).astype(jnp.float32)
    ref = jax.nn.sigmoid(h_ref @ w2b + b2[None, :])
    assert jnp.allclose(out, ref, atol=5e-3, rtol=5e-3)

    print("KERNEL_OK")
</pallas_src>

<mosaic_0001>
module attributes {stable_mosaic.version = 11 : i64} {
  func.func @fcn_kernel(%arg0: i32, %arg1: memref<8x32xf32, #tpu.memory_space<vmem>>, %arg2: memref<32x384xbf16, #tpu.memory_space<vmem>>, %arg3: memref<1x384xf32, #tpu.memory_space<vmem>>, %arg4: memref<384x128xbf16, #tpu.memory_space<vmem>>, %arg5: memref<1x128xf32, #tpu.memory_space<vmem>>, %arg6: memref<8x128xbf16, #tpu.memory_space<vmem>>) attributes {dimension_semantics = [#tpu.dimension_semantics<parallel>], iteration_bounds = array<i64: 1>, scalar_prefetch = 0 : i64, scratch_operands = 0 : i64, tpu.core_type = #tpu.core_type<tc>, window_params = [{transform_indices = @transform_0, window_bounds = array<i64: 8, 32>}, {pipeline_mode = #tpu.pipeline_mode<synchronous>, transform_indices = @transform_1, window_bounds = array<i64: 32, 384>}, {pipeline_mode = #tpu.pipeline_mode<synchronous>, transform_indices = @transform_2, window_bounds = array<i64: 1, 384>}, {pipeline_mode = #tpu.pipeline_mode<synchronous>, transform_indices = @transform_3, window_bounds = array<i64: 384, 128>}, {pipeline_mode = #tpu.pipeline_mode<synchronous>, transform_indices = @transform_4, window_bounds = array<i64: 1, 128>}, {transform_indices = @transform_5, window_bounds = array<i64: 8, 128>}]} {
    %c0 = arith.constant 0 : index
    %c0_0 = arith.constant 0 : index
    %0 = vector.load %arg1[%c0, %c0_0] : memref<8x32xf32, #tpu.memory_space<vmem>>, vector<8x32xf32>
    %1 = arith.truncf %0 : vector<8x32xf32> to vector<8x32xbf16>
    %c0_1 = arith.constant 0 : index
    %c0_2 = arith.constant 0 : index
    %2 = vector.load %arg2[%c0_1, %c0_2] : memref<32x384xbf16, #tpu.memory_space<vmem>>, vector<32x384xbf16>
    %cst = arith.constant dense<0.000000e+00> : vector<8x384xf32>
    %3 = tpu.matmul %1, %2, %cst {dimension_numbers = #tpu.dot_dimension_numbers<[1], [0], [0], [1], [0, 0, 1, 1], [], []>} : vector<8x32xbf16>, vector<32x384xbf16>, vector<8x384xf32> -> vector<8x384xf32>
    %c0_3 = arith.constant 0 : index
    %c0_4 = arith.constant 0 : index
    %4 = vector.load %arg3[%c0_3, %c0_4] : memref<1x384xf32, #tpu.memory_space<vmem>>, vector<1x384xf32>
    %5 = vector.broadcast %4 : vector<1x384xf32> to vector<8x384xf32>
    %6 = arith.addf %3, %5 : vector<8x384xf32>
    %cst_5 = arith.constant 0.000000e+00 : f32
    %7 = vector.broadcast %cst_5 : f32 to vector<8x384xf32>
    %8 = arith.maximumf %6, %7 : vector<8x384xf32>
    %9 = arith.truncf %8 : vector<8x384xf32> to vector<8x384xbf16>
    %c0_6 = arith.constant 0 : index
    %c0_7 = arith.constant 0 : index
    %10 = vector.load %arg4[%c0_6, %c0_7] : memref<384x128xbf16, #tpu.memory_space<vmem>>, vector<384x128xbf16>
    %cst_8 = arith.constant dense<0.000000e+00> : vector<8x128xf32>
    %11 = tpu.matmul %9, %10, %cst_8 {dimension_numbers = #tpu.dot_dimension_numbers<[1], [0], [0], [1], [0, 0, 1, 1], [], []>} : vector<8x384xbf16>, vector<384x128xbf16>, vector<8x128xf32> -> vector<8x128xf32>
    %c0_9 = arith.constant 0 : index
    %c0_10 = arith.constant 0 : index
    %12 = vector.load %arg5[%c0_9, %c0_10] : memref<1x128xf32, #tpu.memory_space<vmem>>, vector<1x128xf32>
    %13 = vector.broadcast %12 : vector<1x128xf32> to vector<8x128xf32>
    %14 = arith.addf %11, %13 : vector<8x128xf32>
    %15 = arith.negf %14 : vector<8x128xf32>
    %16 = math.exp %15 : vector<8x128xf32>
    %cst_11 = arith.constant 1.000000e+00 : f32
    %17 = vector.broadcast %cst_11 : f32 to vector<8x128xf32>
    %18 = arith.addf %17, %16 : vector<8x128xf32>
    %19 = arith.divf %17, %18 : vector<8x128xf32>
    %20 = arith.truncf %19 : vector<8x128xf32> to vector<8x128xbf16>
    %c0_12 = arith.constant 0 : index
    %c0_13 = arith.constant 0 : index
    %21 = vector.load %arg6[%c0_12, %c0_13] : memref<8x128xbf16, #tpu.memory_space<vmem>>, vector<8x128xbf16>
    tpu.vector_store %arg6[%c0_12, %c0_13], %20 {strides = array<i32>} : memref<8x128xbf16, #tpu.memory_space<vmem>>, vector<8x128xbf16>,
    return
  }
  func.func @transform_0(%arg0: i32) -> (i32, i32) {
    %c0_i32 = arith.constant 0 : i32
    %c0_i32_0 = arith.constant 0 : i32
    return %arg0, %c0_i32 : i32, i32
  }
  func.func @transform_1(%arg0: i32) -> (i32, i32) {
    %c0_i32 = arith.constant 0 : i32
    %c0_i32_0 = arith.constant 0 : i32
    %c0_i32_1 = arith.constant 0 : i32
    return %c0_i32, %c0_i32_0 : i32, i32
  }
  func.func @transform_2(%arg0: i32) -> (i32, i32) {
    %c0_i32 = arith.constant 0 : i32
    %c0_i32_0 = arith.constant 0 : i32
    %c0_i32_1 = arith.constant 0 : i32
    return %c0_i32, %c0_i32_0 : i32, i32
  }
  func.func @transform_3(%arg0: i32) -> (i32, i32) {
    %c0_i32 = arith.constant 0 : i32
    %c0_i32_0 = arith.constant 0 : i32
    %c0_i32_1 = arith.constant 0 : i32
    return %c0_i32, %c0_i32_0 : i32, i32
  }
  func.func @transform_4(%arg0: i32) -> (i32, i32) {
    %c0_i32 = arith.constant 0 : i32
    %c0_i32_0 = arith.constant 0 : i32
    %c0_i32_1 = arith.constant 0 : i32
    return %c0_i32, %c0_i32_0 : i32, i32
  }
  func.func @transform_5(%arg0: i32) -> (i32, i32) {
    %c0_i32 = arith.constant 0 : i32
    %c0_i32_0 = arith.constant 0 : i32
    return %arg0, %c0_i32 : i32, i32
  }
}

</mosaic_0001>

<bundles_post_ra>
// kernel: tpu_custom_call.1
= control target key start
LH: loop header
LB: loop body
LE: loop exit
PB: predicated region body
PF: predicated region fallthrough
CT: control target
= control target key end

     0   :  { %10 = vsyncpa [#allocation3], 0  ;;  %s816_s0 = inlined_call_operand.hbm [shape: f32[8,32], index: 0, kind: input, shape index: {}]   ;;  %s817_s1 = inlined_call_operand.hbm [shape: bf16[32,384], index: 1, kind: input, shape index: {}]   ;;  %s818_s2 = inlined_call_operand.vmem [shape: f32[1,384], index: 2, kind: input, shape index: {}]   ;;  %s819_s3 = inlined_call_operand.hbm [shape: bf16[384,128], index: 3, kind: input, shape index: {}]   ;;  %s820_s4 = inlined_call_operand.vmem [shape: f32[1,128], index: 4, kind: input, shape index: {}]   ;;  %s821_s5 = inlined_call_operand.hbm [shape: bf16[8,128], index: 5, kind: output, shape index: {}]  }
   0x1   :  { %11 = vsyncpa [#allocation6], 0 }
   0x2   :  { %12 = vsyncpa [#allocation4], 0  ;;  %s743_s18 = smov [#allocation5]  }
   0x3   :  { %s28_s19 = sshll.u32 %s743_s18, 4  ;;  %s29_s19 = int_to_ptr.vmem [resolvable:$true] %s28_s19 }
   0x4   :  { %s665_s20 = scalar_lea.vmem %s29_s19, 768  ;;  %p670_p1 = scmp.lt.s32.totalorder %s29_s19, %s29_s19 }
   0x5   :  { %p666_p0 = scmp.ne.s32.totalorder %s29_s19, %s665_s20  ;;  %p671_p2 = scmp.lt.s32.totalorder %s665_s20, %s665_s20 }
   0x7   :  { %p672_p3 = por %p671_p2, %p670_p1 }
   0x9   :  { %p673_p4 = pnand %p672_p3, %p666_p0 }
   0xb   :  { %676 = shalt.err (!%p673_p4)
}
   0xc   :  { %s744_s21 = smov 192   ;;  %s745_s22 = smov 12  }
   0xd   :  { %34 = dma.hbm_to_vmem [thread:$0]  %s817_s1, 768, %s29_s19, [#allocation6], %s744_s21, %s744_s21, %s745_s22  }
   0xe   :  { %s746_s25 = smov [#allocation2]   ;;  %s747_s27 = smov [#allocation7]  }
   0xf   :  { %s19_s26 = sshll.u32 %s746_s25, 4  ;;  %s42_s28 = sshll.u32 %s747_s27, 4  ;;  %s20_s26 = int_to_ptr.vmem [resolvable:$true] %s19_s26  ;;  %s43_s28 = int_to_ptr.vmem [resolvable:$true] %s42_s28 }
  0x10   :  { %s685_s29 = scalar_lea.vmem %s20_s26, 128  ;;  %p690_p6 = scmp.lt.s32.totalorder %s20_s26, %s20_s26 }
  0x11   :  { %p686_p5 = scmp.ne.s32.totalorder %s20_s26, %s685_s29  ;;  %p691_p7 = scmp.lt.s32.totalorder %s685_s29, %s685_s29 }
  0x13   :  { %p692_p8 = por %p691_p7, %p690_p6 }
  0x15   :  { %p693_p9 = pnand %p692_p8, %p686_p5 }
  0x17   :  { %696 = shalt.err (!%p693_p9)
}
  0x18   :  { %22 = dma.hbm_to_vmem [thread:$0]  %s816_s0, 128, %s20_s26, [#allocation3]  }
  0x19   :  { %s705_s7 = scalar_lea.vmem %s43_s28, 3072  ;;  %p710_p11 = scmp.lt.s32.totalorder %s43_s28, %s43_s28 }
  0x1a   :  { %p706_p10 = scmp.ne.s32.totalorder %s43_s28, %s705_s7  ;;  %p711_p12 = scmp.lt.s32.totalorder %s705_s7, %s705_s7 }
  0x1c   :  { %p712_p13 = por %p711_p12, %p710_p11 }
  0x1e   :  { %p713_p0 = pnand %p712_p13, %p706_p10 }
  0x20   :  { %716 = shalt.err (!%p713_p0)
}
  0x21   :  { %s748_s1 = smov 64   ;;  %s749_s8 = smov 4  }
  0x22   :  { %48 = dma.hbm_to_vmem [thread:$0]  %s819_s3, 3072, %s43_s28, [#allocation6], %s748_s1, %s748_s1, %s749_s8  }
  0x23   :  { %737 = dma.done.wait [#allocation3], 128  }
  0x24   :  { %738 = vsyncadd [#allocation3], 4294967168 }
  0x25   :  { %739 = dma.done.wait [#allocation6], 3840  }
  0x26   :  { %740 = vsyncadd [#allocation6], 4294963456  ;;  %v750_v0 = vmov 0.0   ;;  %v751_v1 = vmov 0   ;;  %vm752_vm0 = vmmov 0   ;;  %v61_v7 = vld [vmem:[#allocation2] sm:$0xff]  ;;  %v73_v34 = vlaneseq }
  0x27   :  { %582 = vmatprep.subr.bf16.mxu1 %v750_v0  ;;  %156 = vmatprep.mubr.bf16.mxu0 %v751_v1  ;;  %v621_v2 = vld [vmem:[#allocation5 + $0x1c] ss:$12 sps:$4 sm:$0xff]   ;;  %v623_v3 = vld [vmem:[#allocation5 + $0x18] ss:$12 sps:$4 sm:$0xff]   ;;  %v626_v5 = vld [vmem:[#allocation5 + $0x20] ss:$12 sps:$4 sm:$0xff]   ;;  %v62_v10 = vpack.c.bf16 %v61_v7, %v61_v7 }
  0x28   :  { %586 = vmatprep.mubr.msk.bf16.mxu1 %vm752_vm0, %v750_v0  ;;  %136 = vmatprep.subr.bf16.mxu0 %v621_v2  ;;  %v624_v4 = vld [vmem:[#allocation5 + $0x4] ss:$12 sps:$4 sm:$0xff]   ;;  %v627_v6 = vld [vmem:[#allocation5] ss:$12 sps:$4 sm:$0xff]   ;;  %v628_v8 = vld [vmem:[#allocation5 + $0x8] ss:$12 sps:$4 sm:$0xff]  }
  0x29   :  { %137 = vmatpush1.bf16.msra.mxu0 %v623_v3  ;;  %583 = vmatpush3.bf16.msra.mxu1 %v626_v5  ;;  %v629_v9 = vld [vmem:[#allocation7 + $0x78] sm:$0xff]   ;;  %vm120_vm1 = vcmask 261120   ;;  %v632_v12 = vld [vmem:[#allocation7 + $0x70] sm:$0xff]   ;;  %v635_v15 = vld [vmem:[#allocation7 + $0x68] sm:$0xff]   ;;  %v74_v35 = vshrl.u32 %v73_v34, 7  ;;  %s753_s12 = smov [#allocation8]  }
  0x2a   :  { %138 = vmatprep.subr.bf16.mxu0 %v624_v4  ;;  %584 = vmatprep.subr.bf16.mxu1 %v750_v0  ;;  %v630_v11 = vld [vmem:[#allocation7 + $0x38] sm:$0xff]   ;;  %v633_v14 = vld [vmem:[#allocation7 + $0x30] sm:$0xff]   ;;  %v636_v17 = vld [vmem:[#allocation7 + $0x28] sm:$0xff]   ;;  %s504_s13 = sshll.u32 %s753_s12, 4  ;;  %s505_s13 = int_to_ptr.vmem [resolvable:$true] %s504_s13 }
  0x2b   :  { %v631_v13 = vld [vmem:[#allocation7 + $0xb8] sm:$0xff]   ;;  %v634_v16 = vld [vmem:[#allocation7 + $0xb0] sm:$0xff]   ;;  %v638_v18 = vld [vmem:[#allocation7 + $0x60] sm:$0xff]   ;;  %v75_v36 = vsub.s32 0, %v74_v35  ;;  %v79_v38 = vsub.s32 1, %v74_v35  ;;  %v83_v39 = vsub.s32 2, %v74_v35  ;;  %p722_p2 = scmp.lt.s32.totalorder %s505_s13, %s505_s13 }
  0x2c   :  { %v637_v19 = vld [vmem:[#allocation7 + $0xa8] sm:$0xff]   ;;  %v639_v20 = vld [vmem:[#allocation7 + $0x20] sm:$0xff]   ;;  %v641_v21 = vld [vmem:[#allocation7 + $0x58] sm:$0xff]  }
  0x2d   :  { %139 = vmatpush1.bf16.msra.mxu0 %v627_v6  ;;  %585 = vmatpush3.bf16.msra.mxu1 %v628_v8  ;;  %v640_v22 = vld [vmem:[#allocation7 + $0xa0] sm:$0xff]   ;;  %v642_v23 = vld [vmem:[#allocation7 + $0x18] sm:$0xff]   ;;  %v644_v25 = vld [vmem:[#allocation7 + $0x50] sm:$0xff]  }
  0x2e   :  { %551 = vmatprep.subr.bf16.mxu0 %v629_v9  ;;  %590 = vmatprep.subr.bf16.mxu1 %v750_v0  ;;  %v643_v24 = vld [vmem:[#allocation7 + $0x98] sm:$0xff]   ;;  %v645_v26 = vld [vmem:[#allocation7 + $0x10] sm:$0xff]   ;;  %v647_v28 = vld [vmem:[#allocation7 + $0x48] sm:$0xff]  }
  0x2f   :  { %v646_v27 = vld [vmem:[#allocation7 + $0x90] sm:$0xff]   ;;  %v648_v29 = vld [vmem:[#allocation7 + $0x8] sm:$0xff]   ;;  %v650_v31 = vld [vmem:[#allocation7 + $0x40] sm:$0xff]  }
  0x30   :  { %520 = vmatmul.mubr.msk.bf16.vlgmr.msra.gmra.mxu0 %vm120_vm1, %v62_v10  ;;  %587 = vmatmul.mubr.msk.bf16.vlgmr.msra.gmra.mxu1 %vm120_vm1, %v62_v10  ;;  %v649_v30 = vld [vmem:[#allocation7 + $0x88] sm:$0xff]   ;;  %v651_v32 = vld [vmem:[#allocation7] sm:$0xff]  }
  0x31   :  { %552 = vmatpush3.bf16.msra.mxu0 %v630_v11  ;;  %591 = vmatpush3.bf16.msra.mxu1 %v631_v13  ;;  %v652_v33 = vld [vmem:[#allocation7 + $0x80] sm:$0xff]   ;;  %v71_v37 = vld [vmem:[%s818_s2] sm:$0x7] }
  0x32   :  { %553 = vmatprep.subr.bf16.mxu0 %v632_v12  ;;  %606 = vmatprep.mubr.msk.bf16.mxu1 %vm752_vm0, %v750_v0  ;;  %v76_v40 = vrot.slane %v71_v37, %v75_v36  ;;  %v80_v41 = vrot.slane %v71_v37, %v79_v38  ;;  %v84_v42 = vrot.slane %v71_v37, %v83_v39  ;;  %v522_v63 = vld [vmem:[%s820_s4] ss:$0 sm:$0xff]  ;;  %s717_s4 = scalar_lea.vmem %s505_s13, 64 }
  0x33   :  { %592 = vmatprep.subr.bf16.mxu1 %v750_v0  ;;  %p718_p1 = scmp.ne.s32.totalorder %s505_s13, %s717_s4  ;;  %p723_p3 = scmp.lt.s32.totalorder %s717_s4, %s717_s4 }
  0x35   :  { %554 = vmatpush3.bf16.msra.mxu0 %v633_v14  ;;  %593 = vmatpush3.bf16.msra.mxu1 %v634_v16  ;;  %p724_p4 = por %p723_p3, %p722_p2 }
  0x36   :  { %555 = vmatprep.subr.bf16.mxu0 %v635_v15  ;;  %594 = vmatprep.subr.bf16.mxu1 %v750_v0 }
  0x37   :  { %p725_p5 = pnand %p724_p4, %p718_p1 }
  0x39   :  { %556 = vmatpush3.bf16.msra.mxu0 %v636_v17  ;;  %595 = vmatpush3.bf16.msra.mxu1 %v637_v19 }
  0x3a   :  { %557 = vmatprep.subr.bf16.mxu0 %v638_v18  ;;  %596 = vmatprep.subr.bf16.mxu1 %v750_v0 }
  0x3d   :  { %558 = vmatpush3.bf16.msra.mxu0 %v639_v20  ;;  %597 = vmatpush3.bf16.msra.mxu1 %v640_v22 }
  0x3e   :  { %559 = vmatprep.subr.bf16.mxu0 %v641_v21  ;;  %598 = vmatprep.subr.bf16.mxu1 %v750_v0 }
  0x41   :  { %560 = vmatpush3.bf16.msra.mxu0 %v642_v23  ;;  %599 = vmatpush3.bf16.msra.mxu1 %v643_v24 }
  0x42   :  { %561 = vmatprep.subr.bf16.mxu0 %v644_v25  ;;  %600 = vmatprep.subr.bf16.mxu1 %v750_v0 }
  0x45   :  { %562 = vmatpush3.bf16.msra.mxu0 %v645_v26  ;;  %601 = vmatpush3.bf16.msra.mxu1 %v646_v27 }
  0x46   :  { %602 = vmatprep.subr.bf16.mxu1 %v750_v0  ;;  %563 = vmatprep.subr.bf16.mxu0 %v647_v28 }
  0x49   :  { %564 = vmatpush3.bf16.msra.mxu0 %v648_v29  ;;  %603 = vmatpush3.bf16.msra.mxu1 %v649_v30 }
  0x4a   :  { %604 = vmatprep.subr.bf16.mxu1 %v750_v0  ;;  %565 = vmatprep.subr.bf16.mxu0 %v650_v31 }
  0x4d   :  { %566 = vmatpush3.bf16.msra.mxu0 %v651_v32  ;;  %605 = vmatpush3.bf16.msra.mxu1 %v652_v33 }
  0xf0   :  { %v158_v43 = vpop.f32.mrf.mxu0  ;;  %v199_v46 = vpop.f32.mrf.mxu1 }
  0xf1   :  { %v159_v44 = vadd.f32 %v158_v43, %v76_v40  ;;  %v200_v48 = vadd.f32 %v199_v46, %v84_v42 }
  0xf2   :  { %v160_v45 = vpop.f32.mrf.mxu0  ;;  %v588_v51 = vpop.f32.mrf.mxu1 }
  0xf3   :  { %v161_v47 = vadd.f32 %v160_v45, %v80_v41  ;;  %v205_v49 = vmax.f32 %v159_v44, 0.0  ;;  %v207_v53 = vmax.f32 %v200_v48, 0.0 }
  0xf4   :  { %v162_v50 = vpop.f32.mrf.mxu0  ;;  %v202_v55 = vpop.f32.mrf.mxu1 }
  0xf5   :  { %v206_v52 = vmax.f32 %v161_v47, 0.0  ;;  %v210_v57 = vpack.c.bf16 %v207_v53, %v207_v53  ;;  %v208_v58 = vpack.c.bf16 %v205_v49, %v205_v49 }
  0xf6   :  { %v163_v54 = vpop.f32.mrf.mxu0  ;;  %v589_v59 = vpop.f32.mrf.mxu1 }
  0xf7   :  { %v209_v56 = vpack.c.bf16 %v206_v52, %v206_v52  ;;  %607 = vmatmul.mubr.bf16.vlgmr.msra.gmra.mxu1 %v210_v57 }
  0xf9   :  { %442 = vmatprep.mubr.bf16.mxu0 %v209_v56 }
  0xfa   :  { %443 = vmatmul.mubr.bf16.vlgmr.msra.gmra.mxu0 %v208_v58 }
 0x1b7   :  { %v484_v60 = vpop.f32.mrf.mxu1 }
 0x1b9   :  { %v608_v62 = vpop.f32.mrf.mxu1 }
 0x1ba   :  { %v567_v61 = vpop.f32.mrf.mxu0 }
 0x1bb   :  { %v487_v2 = vpop.f32.mrf.mxu1 }
 0x1bc   :  { %v568_v0 = vpop.f32.mrf.mxu0 }
 0x1bd   :  { %v569_v1 = vadd.f32 %v568_v0, %v567_v61  ;;  %v609_v5 = vpop.f32.mrf.mxu1 }
 0x1be   :  { %v570_v3 = vpop.f32.mrf.mxu0 }
 0x1bf   :  { %v445_v4 = vadd.f32 %v569_v1, %v522_v63 }
 0x1c0   :  { %v571_v6 = vpop.f32.mrf.mxu0 }
 0x1c1   :  { %v485_v7 = vadd.f32 %v484_v60, %v445_v4 }
 0x1c3   :  { %v547_v8 = vmul.f32 -1.442695, %v485_v7 }
 0x1c5   :  { %653 = vpow2.f32 %v547_v8 }
 0x1d2   :  { %v654_v9 = vpop.eup %653 }
 0x1d3   :  { %v493_v10 = vadd.f32 1.0, %v654_v9 }
 0x1d5   :  { %655 = vrcp.f32 %v493_v10 }
 0x1e2   :  { %v656_v11 = vpop.eup %655 }
 0x1e3   :  { %v496_v12 = vpack.c.bf16 %v656_v11, %v656_v11 }
 0x1e5   :  { %497 = vst [vmem:[#allocation8] sm:$0xf] %v496_v12 }
 0x1e6   :  { %728 = shalt.err (!%p725_p5)
}
 0x1e7   :  { %507 = dma.vmem_to_hbm [thread:$0]  %s505_s13, 64, %s821_s5, [#allocation4]  }
 0x1e8   :  { %741 = dma.done.wait [#allocation4], 64  }
 0x1e9   :  { %742 = vsyncadd [#allocation4], 4294967232 }
 0x1ea   :  { %511 = vsyncpa [#allocation3], 1 }
 0x1eb   :  { %512 = vsyncpa [#allocation6], 1 }
 0x1ec   :  { %513 = vsyncpa [#allocation4], 1 }

</bundles_post_ra>
